<compile_context>
chip_gen: v5e
topology: v5e:2x2
jax: 0.10.0
libtpu: 0.0.40
codegen_flags: <defaults>
</compile_context>

<pallas_src>
import functools

import jax
import jax.numpy as jnp
from jax.experimental import pallas as pl
from jax.experimental.pallas import tpu as pltpu


# -----------------------------------------------------------------------------
# Kernels
# -----------------------------------------------------------------------------
def _slrc_forward_kernel(base_ref, excit_ref, pred_ref):
    """prediction_tile = base + excitation (both scalar 0 in the base class)."""
    val = base_ref[0, 0] + excit_ref[0, 0]          # SMEM scalar reads
    # Full-vreg, unmasked 128-lane stores (lane-dense output slab).
    pred_ref[...] = jnp.zeros_like(pred_ref) + val


def _slrc_loss_kernel(x_ref, loss_ref, acc_ref, *, inv_batch):
    """BPR loss: -mean(log(sigmoid(margin))) over a lane-dense margin slab.

    x_ref:   (tile_rows, 128) margins; padded entries hold +1e30 -> log-sigmoid
             is exactly 0, so no mask is needed.
    acc_ref: (8, 128) vreg-shaped partial-sum accumulator (VPU adds only);
             the single XLU reduction to (1, 1) happens in the finalize step.
    """
    i = pl.program_id(0)

    @pl.when(i == 0)
    def _():
        acc_ref[...] = jnp.zeros_like(acc_ref)

    x = x_ref[...]                                                  # (tr, 128)
    # stable log(sigmoid(x)) = min(x, 0) - log(1 + exp(-|x|))
    log_sig = jnp.minimum(x, 0.0) - jnp.log1p(jnp.exp(-jnp.abs(x)))
    tr = x.shape[0]
    # Fold the tile into vreg-shaped partials: (tr//8, 8, 128) summed over the
    # leading axis is a tree of elementwise VPU adds (no XLU, no lane crossing).
    acc_ref[...] += jnp.sum(log_sig.reshape(tr // 8, 8, 128), axis=0)

    @pl.when(i == pl.num_programs(0) - 1)
    def _():
        loss_ref[...] = -jnp.sum(acc_ref[...], keepdims=True) * inv_batch


# -----------------------------------------------------------------------------
# Wrappers
# -----------------------------------------------------------------------------
def slrc_forward(feed_dict):
    """Mirrors SLRC.forward(feed_dict) -> {'prediction': base + excitation}."""
    item_id = feed_dict['item_id']                   # (B, N) int32
    B, N = item_id.shape
    total = B * N

    # Base class: _forward_CF / _forward_excit are stubs returning 0 (scalars).
    # TODO(synk): concrete SLRC subclasses would supply CF embeddings and a
    # Hawkes excitation term here; they would become real kernel inputs
    # (bf16 MXU tiles sized against v7x's 64 MiB VMEM).
    base = jnp.zeros((1, 1), jnp.float32)
    excitation = jnp.zeros((1, 1), jnp.float32)

    # Lane-dense slab: (rows, 128) with rows a multiple of 8 -> full vregs,
    # unmasked 128-lane stores.
    rows = max(8, pl.cdiv(total, 128))
    rows = pl.cdiv(rows, 8) * 8

    # Row tile: full-vreg blocks up to ~1 MiB per grid step; keep >=2 parallel
    # steps when the slab is big enough so v7x megacore can split the fill.
    tile_rows = min(rows, 2048)                      # 2048*128*4 B = 1 MiB
    if rows > 8 and tile_rows == rows and (rows // 2) % 8 == 0:
        tile_rows = rows // 2
    rows_pad = pl.cdiv(rows, tile_rows) * tile_rows  # divisible grid

    slab = pl.pallas_call(
        _slrc_forward_kernel,
        out_shape=jax.ShapeDtypeStruct((rows_pad, 128), jnp.float32),
        grid=(rows_pad // tile_rows,),
        in_specs=[
            pl.BlockSpec(memory_space=pltpu.MemorySpace.SMEM),   # base (scalar)
            pl.BlockSpec(memory_space=pltpu.MemorySpace.SMEM),   # excitation (scalar)
        ],
        out_specs=pl.BlockSpec((tile_rows, 128), lambda i: (i, 0)),
        compiler_params=pltpu.CompilerParams(
            dimension_semantics=("parallel",),
            vmem_limit_bytes=32 * 1024 * 1024,
        ),
    )(base, excitation)

    # Reshape back to (B, N): free for contiguous row-major when total is a
    # multiple of 1024; otherwise a cheap slice of the constant-filled tail.
    pred = slab.reshape(-1)[:total].reshape(B, N)
    return {'prediction': pred}


def slrc_loss(out_dict):
    """Mirrors SLRC.loss(out_dict) -> scalar BPR loss."""
    pred = out_dict['prediction']
    B = pred.shape[0]

    # Margin computed in the wrapper (one fused XLA op); the kernel only
    # streams B floats instead of 2B.
    x = (pred[:, 0] - pred[:, 1]).astype(jnp.float32)

    # Pad the *margin* with a huge positive value: stable log-sigmoid of it is
    # exactly 0 in f32, so padded lanes need no in-kernel mask (and no inf-inf
    # NaN risk since pos/neg are never padded separately).
    PAD_VAL = 1e30

    total = pl.cdiv(B, 1024) * 1024                  # lane-dense, rows % 8 == 0
    rows = total // 128
    tile_rows = min(rows, 1024)                      # 1024*128*4 B = 512 KiB/step
    rows = pl.cdiv(rows, tile_rows) * tile_rows      # divisible grid
    total = rows * 128

    x_pad = jnp.pad(x, (0, total - B), constant_values=PAD_VAL).reshape(rows, 128)

    loss = pl.pallas_call(
        functools.partial(_slrc_loss_kernel, inv_batch=1.0 / B),
        out_shape=jax.ShapeDtypeStruct((1, 1), jnp.float32),
        grid=(rows // tile_rows,),
        in_specs=[pl.BlockSpec((tile_rows, 128), lambda i: (i, 0))],
        out_specs=pl.BlockSpec((1, 1), lambda i: (0, 0)),   # resident output
        scratch_shapes=[pltpu.VMEM((8, 128), jnp.float32)], # vreg-shaped acc
        compiler_params=pltpu.CompilerParams(
            dimension_semantics=("arbitrary",),              # reduction carrier
            vmem_limit_bytes=32 * 1024 * 1024,
        ),
    )(x_pad)
    return loss[0, 0]


# -----------------------------------------------------------------------------
# Main
# -----------------------------------------------------------------------------
if __name__ == "__main__":
    key = jax.random.PRNGKey(0)
    k_u, k_i, k_t, k_p, k_q = jax.random.split(key, 5)

    # Small, deterministic synthetic batch consistent with SLRC.Dataset output.
    B = 8            # batch size
    N = 4            # 1 positive + 3 negative items
    H = 5            # padded history length for time intervals
    n_users, n_items = 10, 20

    feed_dict = {
        'user_id': jax.random.randint(k_u, (B,), 0, n_users, dtype=jnp.int32),
        'item_id': jax.random.randint(k_i, (B, N), 0, n_items, dtype=jnp.int32),
        'time_intervals': jax.random.uniform(k_t, (B, N, H), jnp.float32, 0.0, 100.0),
    }

    # --- base-class forward + loss ---
    out_dict = slrc_forward(feed_dict)
    pred = jax.block_until_ready(out_dict['prediction'])
    loss = jax.block_until_ready(slrc_loss(out_dict))

    ref_pred = jnp.zeros((B, N), jnp.float32)
    ref_loss = -jnp.mean(jnp.log(jax.nn.sigmoid(ref_pred[:, 0] - ref_pred[:, 1])))
    assert pred.shape == (B, N)
    assert jnp.allclose(pred, ref_pred)
    assert jnp.allclose(loss, ref_loss, atol=1e-6)

    # --- forward with B not aligned to the lane-dense tiling (exercises the
    #     slab slice-back path) ---
    B3, N3 = 700, 4
    feed3 = {'item_id': jax.random.randint(k_i, (B3, N3), 0, n_items, dtype=jnp.int32)}
    pred3 = jax.block_until_ready(slrc_forward(feed3)['prediction'])
    assert pred3.shape == (B3, N3)
    assert jnp.allclose(pred3, jnp.zeros((B3, N3), jnp.float32))

    # --- loss kernel on non-trivial predictions (exercises pad value + layout) ---
    B2, N2 = 200, 4
    pred2 = jax.random.normal(k_p, (B2, N2), jnp.float32)
    loss2 = jax.block_until_ready(slrc_loss({'prediction': pred2}))
    ref_loss2 = -jnp.mean(jnp.log(jax.nn.sigmoid(pred2[:, 0] - pred2[:, 1])))
    assert jnp.allclose(loss2, ref_loss2, atol=1e-5, rtol=1e-5)

    pred4 = jax.random.normal(k_q, (B3, N3), jnp.float32) * 3.0
    loss4 = jax.block_until_ready(slrc_loss({'prediction': pred4}))
    ref_loss4 = -jnp.mean(jnp.log(jax.nn.sigmoid(pred4[:, 0] - pred4[:, 1])))
    assert jnp.allclose(loss4, ref_loss4, atol=1e-5, rtol=1e-5)

    print("KERNEL_OK")
</pallas_src>

<mosaic_0001>
module attributes {stable_mosaic.version = 11 : i64} {
  func.func @_slrc_forward_kernel(%arg0: i32, %arg1: memref<1x1xf32, #tpu.memory_space<smem>>, %arg2: memref<1x1xf32, #tpu.memory_space<smem>>, %arg3: memref<8x128xf32, #tpu.memory_space<vmem>>) attributes {dimension_semantics = [#tpu.dimension_semantics<parallel>], iteration_bounds = array<i64: 1>, scalar_prefetch = 0 : i64, scratch_operands = 0 : i64, tpu.core_type = #tpu.core_type<tc>, window_params = [{transform_indices = @transform_0, window_bounds = array<i64: 1, 1>}, {transform_indices = @transform_1, window_bounds = array<i64: 1, 1>}, {transform_indices = @transform_2, window_bounds = array<i64: 8, 128>}]} {
    %c0 = arith.constant 0 : index
    %c0_0 = arith.constant 0 : index
    %0 = memref.load %arg1[%c0, %c0_0] : memref<1x1xf32, #tpu.memory_space<smem>>
    %c0_1 = arith.constant 0 : index
    %c0_2 = arith.constant 0 : index
    %1 = memref.load %arg2[%c0_1, %c0_2] : memref<1x1xf32, #tpu.memory_space<smem>>
    %2 = arith.addf %0, %1 : f32
    %cst = arith.constant 0.000000e+00 : f32
    %3 = vector.broadcast %cst : f32 to vector<8x128xf32>
    %4 = vector.broadcast %2 : f32 to vector<8x128xf32>
    %5 = arith.addf %3, %4 : vector<8x128xf32>
    %c0_3 = arith.constant 0 : index
    %c0_4 = arith.constant 0 : index
    %6 = vector.load %arg3[%c0_3, %c0_4] : memref<8x128xf32, #tpu.memory_space<vmem>>, vector<8x128xf32>
    tpu.vector_store %arg3[%c0_3, %c0_4], %5 {strides = array<i32>} : memref<8x128xf32, #tpu.memory_space<vmem>>, vector<8x128xf32>,
    return
  }
  func.func @transform_0(%arg0: i32) -> (i32, i32) {
    %c0_i32 = arith.constant 0 : i32
    %c0_i32_0 = arith.constant 0 : i32
    %c0_i32_1 = arith.constant 0 : i32
    return %c0_i32, %c0_i32_0 : i32, i32
  }
  func.func @transform_1(%arg0: i32) -> (i32, i32) {
    %c0_i32 = arith.constant 0 : i32
    %c0_i32_0 = arith.constant 0 : i32
    %c0_i32_1 = arith.constant 0 : i32
    return %c0_i32, %c0_i32_0 : i32, i32
  }
  func.func @transform_2(%arg0: i32) -> (i32, i32) {
    %c0_i32 = arith.constant 0 : i32
    %c0_i32_0 = arith.constant 0 : i32
    return %arg0, %c0_i32 : i32, i32
  }
}

</mosaic_0001>

<bundles_post_ra>
// kernel: tpu_custom_call.1
= control target key start
LH: loop header
LB: loop body
LE: loop exit
PB: predicated region body
PF: predicated region fallthrough
CT: control target
= control target key end

     0   :  { %s88_s0 = inlined_call_operand.<no memory space> [shape: f32[1,1], index: 0, kind: input, shape index: {}]   ;;  %s89_s1 = inlined_call_operand.<no memory space> [shape: f32[1,1], index: 1, kind: input, shape index: {}]   ;;  %s90_s2 = inlined_call_operand.hbm [shape: f32[8,128], index: 2, kind: output, shape index: {}]  }
   0x1   :  { %s16_s13 = sadd.f32 %s89_s1, %s88_s0 }
   0x2   :  { %9 = vsyncpa [#allocation5], 0  ;;  %s63_s14 = smov [#allocation4]   ;;  %s27_s18 = sshll.u32 %s90_s2, 4  ;;  %s28_s18 = int_to_ptr.hbm [resolvable:$true] %s27_s18 }
   0x3   :  { %s25_s15 = sshll.u32 %s63_s14, 4  ;;  %v17_v0 = vstv %s16_s13  ;;  %s26_s15 = int_to_ptr.vmem [resolvable:$true] %s25_s15 }
   0x4   :  { %19 = vst [vmem:[#allocation4] sm:$0xff] %v17_v0 }
   0x5   :  { %30 = dma.vmem_to_hbm [thread:$0]  %s26_s15, 128, %s28_s18, [#allocation5]  }
   0x6   :  { %61 = dma.done.wait [#allocation5], 128  }
   0x7   :  { %62 = vsyncadd [#allocation5], 4294967168 }
   0x8   :  { %35 = vsyncpa [#allocation5], 1 }

</bundles_post_ra>
